<compile_context>
chip_gen: v7x
topology: tpu7x:2x2x1
jax: 0.10.0
libtpu: 0.0.40
codegen_flags: <defaults>
</compile_context>

<pallas_src>
import functools

import jax
import jax.numpy as jnp
import numpy as np
from jax import lax
from jax.experimental import pallas as pl
from jax.experimental.pallas import tpu as pltpu


# ---------------------------------------------------------------------------
# Small helpers
# ---------------------------------------------------------------------------
_CHUNK_PILLARS = 64   # in-kernel compute chunk; bounds f32 temps to a few MiB


def _round_up(x, m):
    return ((x + m - 1) // m) * m


def _cdiv(a, b):
    return (a + b - 1) // b


def _vmem_capacity_bytes():
    try:
        return int(pltpu.get_tpu_info().vmem_capacity_bytes)
    except Exception:
        return 64 * 1024 * 1024           # conservative: v7x per-core VMEM


def _compiler_params(**kwargs):
    cls = getattr(pltpu, "CompilerParams", None)
    if cls is None:                        # older JAX releases
        cls = pltpu.TPUCompilerParams
    return cls(**kwargs)


# ---------------------------------------------------------------------------
# Kernels
# ---------------------------------------------------------------------------
def _pfn_compute_chunk(x_chunk, w, shift):
    """Linear (BN scale pre-folded into `w`) -> +shift -> ReLU for one chunk.

    x_chunk: (cp, N, Cin); w: (Cin, U) (f32 or bf16); shift: (1, U) f32.
    Returns (cp, N, U) f32.
    """
    cp, n, cin = x_chunk.shape
    units = w.shape[1]
    y = jnp.dot(x_chunk.reshape(cp * n, cin).astype(w.dtype), w,
                preferred_element_type=jnp.float32)
    y = jnp.maximum(y + shift, 0.0)
    return y.reshape(cp, n, units)


def _for_each_chunk(x_ref, chunk_p, fn):
    """Run fn(index, x_chunk) over pillar chunks of the current block.

    Single-chunk fast path uses static full-block access; otherwise a
    fori_loop over aligned (multiple-of-8) dynamic slices.
    """
    tp = x_ref.shape[0]
    if tp == chunk_p:
        fn(Ellipsis, x_ref[...])
        return
    assert tp % chunk_p == 0 and chunk_p % 8 == 0

    def body(c, carry):
        start = pl.multiple_of(c * chunk_p, chunk_p)
        idx = pl.ds(start, chunk_p)
        fn(idx, x_ref[idx])
        return carry

    lax.fori_loop(0, tp // chunk_p, body, 0)


def _pfn_concat_kernel(x_ref, w_ref, shift_ref, out_ref, *, chunk_p):
    """Per chunk: linear+BN-shift+ReLU -> per-pillar max -> single full-width
    store of [features | repeated max] (concat built in registers)."""
    w = w_ref[...]
    shift = shift_ref[...]

    def emit(idx, x_chunk):
        y = _pfn_compute_chunk(x_chunk, w, shift)                      # f32
        # Cast the max once, before the N-fold broadcast.
        y_max = jnp.max(y, axis=1, keepdims=True).astype(out_ref.dtype)
        y = y.astype(out_ref.dtype)
        out_ref[idx] = jnp.concatenate(
            [y, jnp.broadcast_to(y_max, y.shape)], axis=-1)

    _for_each_chunk(x_ref, chunk_p, emit)


def _pfn_last_kernel(x_ref, w_ref, shift_ref, out_ref, *, chunk_p):
    """Last-layer variant: output block is a lane/sublane-dense (tile, U)."""
    w = w_ref[...]
    shift = shift_ref[...]

    def emit(idx, x_chunk):
        y = _pfn_compute_chunk(x_chunk, w, shift)
        out_ref[idx] = jnp.max(y, axis=1).astype(out_ref.dtype)

    _for_each_chunk(x_ref, chunk_p, emit)


def _pfn_split_kernel(x_ref, w_ref, shift_ref, feat_ref, max_ref, *, chunk_p):
    """Opt-in variant: emit (features, per-pillar max) separately instead of
    writing the max repeated N times (about 50% fewer output bytes)."""
    w = w_ref[...]
    shift = shift_ref[...]

    def emit(idx, x_chunk):
        y = _pfn_compute_chunk(x_chunk, w, shift)
        feat_ref[idx] = y.astype(feat_ref.dtype)
        max_ref[idx] = jnp.max(y, axis=1).astype(max_ref.dtype)

    _for_each_chunk(x_ref, chunk_p, emit)


# ---------------------------------------------------------------------------
# Tile sizing (lane/sublane-padded footprints)
# ---------------------------------------------------------------------------
def _auto_tile_p(N, Cin, units, last_layer, split_output, in_dtype, out_dtype,
                 chunk_p, budget_bytes):
    """Largest pillar tile whose double-buffered, lane/sublane-PADDED blocks
    plus the per-chunk f32 compute temps fit `budget_bytes` of VMEM."""
    in_isz = jnp.dtype(in_dtype).itemsize
    out_isz = jnp.dtype(out_dtype).itemsize
    sub_in = max(8, 32 // in_isz)          # sublane multiple per dtype
    sub_out = max(8, 32 // out_isz)

    lane_cin = _round_up(Cin, 128)
    lane_u = _round_up(units, 128)
    lane_2u = _round_up(2 * units, 128)

    # Double-buffered HBM<->VMEM blocks, per pillar (padded layouts!).
    per_pillar = 2 * _round_up(N, sub_in) * lane_cin * in_isz
    if last_layer:
        per_pillar += 2 * lane_u * out_isz
    elif split_output:
        per_pillar += 2 * (_round_up(N, sub_out) * lane_u + lane_u) * out_isz
    else:
        per_pillar += 2 * _round_up(N, sub_out) * lane_2u * out_isz

    # Per-chunk compute temps (x copy, f32 matmul/ReLU output, cast copies,
    # concat value), 1.5x fudge for compiler temps, plus weight/shift blocks.
    temps = chunk_p * N * (lane_cin * 4 + lane_u * 4 + lane_u * out_isz
                           + (0 if last_layer else lane_2u * max(out_isz, 2)))
    fixed = (3 * temps) // 2 + 4 * _round_up(Cin, 8) * lane_u * 4

    tile = (int(budget_bytes) - fixed) // max(per_pillar, 1)
    return max(8, min(tile, 8192))


# ---------------------------------------------------------------------------
# Wrapper
# ---------------------------------------------------------------------------
@functools.partial(
    jax.jit,
    static_argnames=("last_layer", "split_output", "tile_p", "out_dtype",
                     "matmul_in_bf16"))
def pfn_layer(inputs, weight, gamma, beta, running_mean, running_var, *,
              eps=1e-3, last_layer=False, split_output=False, tile_p=None,
              out_dtype=None, matmul_in_bf16=False):
    """Pallas PFNLayer forward (eval-mode BatchNorm).

    inputs : (P, N, C_in)       weight: (units, C_in)  (nn.Linear, bias=False)
    gamma, beta, running_mean, running_var: (units,)
    Returns (P, N, 2*units) (concat), (P, 1, units) (last layer), or the pair
    ((P, N, units), (P, units)) when split_output=True.
    """
    P, N, Cin = inputs.shape
    units = weight.shape[0]
    if weight.shape[1] != Cin:
        raise ValueError("weight must be (units, C_in)")
    split_output = bool(split_output) and not last_layer

    out_dt = jnp.dtype(inputs.dtype) if out_dtype is None else jnp.dtype(out_dtype)
    mm_dt = jnp.bfloat16 if matmul_in_bf16 else jnp.float32

    # Fold eval-mode BN: scale into the (tiny) weight, shift applied in-kernel.
    scale = (gamma / jnp.sqrt(running_var + eps)).astype(jnp.float32)       # (U,)
    w_scaled = (weight.astype(jnp.float32).T * scale[None, :]).astype(mm_dt)  # (Cin,U)
    shift = (beta - running_mean * scale).reshape(1, units).astype(jnp.float32)

    # --- per-generation VMEM budget & pillar tile -------------------------
    vmem_cap = _vmem_capacity_bytes()
    budget = int(0.45 * vmem_cap)          # double-buffered working-set target
    vmem_limit = int(0.70 * vmem_cap)      # headroom over the budget

    chunk_cap = _CHUNK_PILLARS
    if P < 8:
        # 2-D output blocks need a sublane dim that is a multiple of 8 OR the
        # full extent: with fewer than 8 pillars use one exact block.
        tp = P
    else:
        if tile_p is None:
            tp = _auto_tile_p(N, Cin, units, last_layer, split_output,
                              inputs.dtype, out_dt, chunk_cap, budget)
            # Keep >= min(8, ceil(P/8)) grid steps: feeds both v7x TCs and
            # overlaps DMA with compute everywhere.
            target_steps = min(8, _cdiv(P, 8))
            tp = min(tp, _round_up(_cdiv(P, target_steps), 8))
        else:
            tp = int(tile_p)
        tp = max(8, min(_round_up(tp, 8), _round_up(P, 8)))
        if tp > chunk_cap:                  # keep tile a multiple of the chunk
            tp = (tp // chunk_cap) * chunk_cap
    chunk_p = min(chunk_cap, tp)

    # No explicit padding / post-slice: Pallas masks the partial boundary
    # block (per-pillar max => garbage rows never contaminate real outputs).
    grid = (_cdiv(P, tp),)

    x_spec = pl.BlockSpec((tp, N, Cin), lambda i: (i, 0, 0))
    w_spec = pl.BlockSpec((Cin, units), lambda i: (0, 0))
    s_spec = pl.BlockSpec((1, units), lambda i: (0, 0))

    if last_layer:
        kernel = functools.partial(_pfn_last_kernel, chunk_p=chunk_p)
        out_shape = jax.ShapeDtypeStruct((P, units), out_dt)
        out_specs = pl.BlockSpec((tp, units), lambda i: (i, 0))
    elif split_output:
        kernel = functools.partial(_pfn_split_kernel, chunk_p=chunk_p)
        out_shape = (jax.ShapeDtypeStruct((P, N, units), out_dt),
                     jax.ShapeDtypeStruct((P, units), out_dt))
        out_specs = (pl.BlockSpec((tp, N, units), lambda i: (i, 0, 0)),
                     pl.BlockSpec((tp, units), lambda i: (i, 0)))
    else:
        kernel = functools.partial(_pfn_concat_kernel, chunk_p=chunk_p)
        out_shape = jax.ShapeDtypeStruct((P, N, 2 * units), out_dt)
        out_specs = pl.BlockSpec((tp, N, 2 * units), lambda i: (i, 0, 0))

    out = pl.pallas_call(
        kernel,
        out_shape=out_shape,
        grid=grid,
        in_specs=[x_spec, w_spec, s_spec],
        out_specs=out_specs,
        compiler_params=_compiler_params(
            dimension_semantics=("parallel",),
            vmem_limit_bytes=vmem_limit),
    )(inputs, w_scaled, shift)

    if last_layer:
        return out.reshape(P, 1, units)     # module returns (P, 1, units)
    return out


# ---------------------------------------------------------------------------
# Pure-JAX reference (mirrors the PyTorch forward, eval-mode BN)
# ---------------------------------------------------------------------------
def pfn_layer_ref(inputs, weight, gamma, beta, running_mean, running_var,
                  *, eps=1e-3, last_layer=False):
    x = jnp.einsum("pnc,uc->pnu", inputs, weight)
    x = (x - running_mean) / jnp.sqrt(running_var + eps) * gamma + beta
    x = jnp.maximum(x, 0.0)
    x_max = jnp.max(x, axis=1, keepdims=True)
    if last_layer:
        return x_max
    x_rep = jnp.broadcast_to(x_max, x.shape)
    return jnp.concatenate([x, x_rep], axis=-1)


# ---------------------------------------------------------------------------
if __name__ == "__main__":
    # Small shapes consistent with the module:
    #   P = 8 pillars, N = 32 points/pillar, in_channels = 16, out_channels = 64
    #   (non-last layer -> units = 32, output channels = 64)
    P, N, C_in, out_channels = 8, 32, 16, 64
    units = out_channels // 2

    key = jax.random.PRNGKey(0)
    k_in, k_w = jax.random.split(key)
    inputs = jax.random.normal(k_in, (P, N, C_in), dtype=jnp.float32)
    weight = jax.random.normal(k_w, (units, C_in), dtype=jnp.float32) * 0.1

    gamma = jnp.linspace(0.5, 1.5, units, dtype=jnp.float32)
    beta = jnp.linspace(-0.1, 0.1, units, dtype=jnp.float32)
    running_mean = jnp.linspace(-0.05, 0.05, units, dtype=jnp.float32)
    running_var = jnp.linspace(0.8, 1.2, units, dtype=jnp.float32)
    args = (inputs, weight, gamma, beta, running_mean, running_var)

    # The MXU may evaluate f32 matmuls as a multi-pass bf16 decomposition, so
    # allow a small slack vs. the XLA reference; bf16 output path gets more.
    TOL32 = dict(rtol=5e-3, atol=5e-3)
    TOL16 = dict(rtol=5e-2, atol=5e-2)

    # 1) Non-last (concat) layer, f32.
    out = jax.block_until_ready(pfn_layer(*args, last_layer=False))
    ref = pfn_layer_ref(*args, last_layer=False)
    np.testing.assert_allclose(np.asarray(out), np.asarray(ref), **TOL32)

    # 2) Last layer -> (P, 1, units).
    out_last = jax.block_until_ready(pfn_layer(*args, last_layer=True))
    ref_last = pfn_layer_ref(*args, last_layer=True)
    np.testing.assert_allclose(np.asarray(out_last), np.asarray(ref_last), **TOL32)

    # 3) P not a multiple of the tile: exercises the no-pad cdiv grid with a
    #    masked partial boundary block (P=20, tile_p=8 -> 3 grid steps).
    P2 = 20
    inputs2 = jax.random.normal(jax.random.PRNGKey(1), (P2, N, C_in), jnp.float32)
    args2 = (inputs2,) + args[1:]
    out2 = jax.block_until_ready(pfn_layer(*args2, last_layer=False, tile_p=8))
    ref2 = pfn_layer_ref(*args2, last_layer=False)
    np.testing.assert_allclose(np.asarray(out2), np.asarray(ref2), **TOL32)

    # 4) P < 8 path (single exact block, no masking at all).
    args3 = (inputs[:6],) + args[1:]
    out3 = jax.block_until_ready(pfn_layer(*args3, last_layer=False))
    ref3 = pfn_layer_ref(*args3, last_layer=False)
    np.testing.assert_allclose(np.asarray(out3), np.asarray(ref3), **TOL32)

    # 5) Multi-chunk fori_loop path + partial block + bandwidth levers
    #    (bf16 output, bf16 MXU operands): P=300, tile_p=256 -> 2 chunks/block.
    P4 = 300
    inputs4 = jax.random.normal(jax.random.PRNGKey(2), (P4, N, C_in), jnp.float32)
    args4 = (inputs4,) + args[1:]
    out4 = jax.block_until_ready(
        pfn_layer(*args4, last_layer=False, tile_p=256,
                  out_dtype=jnp.bfloat16, matmul_in_bf16=True))
    ref4 = pfn_layer_ref(*args4, last_layer=False)
    np.testing.assert_allclose(np.asarray(out4.astype(jnp.float32)),
                               np.asarray(ref4), **TOL16)

    # 6) Opt-in split (features, per-pillar max) outputs: reconstruct the
    #    concat output and compare against the reference.
    feats, pmax = jax.block_until_ready(
        pfn_layer(*args, last_layer=False, split_output=True))
    recon = jnp.concatenate(
        [feats, jnp.broadcast_to(pmax[:, None, :], feats.shape)], axis=-1)
    np.testing.assert_allclose(np.asarray(recon), np.asarray(ref), **TOL32)

    print("KERNEL_OK")
</pallas_src>

<mosaic_0001>
module attributes {stable_mosaic.version = 11 : i64} {
  func.func @_pfn_concat_kernel(%arg0: i32, %arg1: memref<8x32x16xf32, #tpu.memory_space<vmem>>, %arg2: memref<16x32xf32, #tpu.memory_space<vmem>>, %arg3: memref<1x32xf32, #tpu.memory_space<vmem>>, %arg4: memref<8x32x64xf32, #tpu.memory_space<vmem>>) attributes {dimension_semantics = [#tpu.dimension_semantics<parallel>], iteration_bounds = array<i64: 1>, scalar_prefetch = 0 : i64, scratch_operands = 0 : i64, tpu.core_type = #tpu.core_type<tc>, window_params = [{transform_indices = @transform_0, window_bounds = array<i64: 8, 32, 16>}, {pipeline_mode = #tpu.pipeline_mode<synchronous>, transform_indices = @transform_1, window_bounds = array<i64: 16, 32>}, {pipeline_mode = #tpu.pipeline_mode<synchronous>, transform_indices = @transform_2, window_bounds = array<i64: 1, 32>}, {transform_indices = @transform_3, window_bounds = array<i64: 8, 32, 64>}]} {
    %c0 = arith.constant 0 : index
    %c0_0 = arith.constant 0 : index
    %0 = vector.load %arg2[%c0, %c0_0] : memref<16x32xf32, #tpu.memory_space<vmem>>, vector<16x32xf32>
    %c0_1 = arith.constant 0 : index
    %c0_2 = arith.constant 0 : index
    %1 = vector.load %arg3[%c0_1, %c0_2] : memref<1x32xf32, #tpu.memory_space<vmem>>, vector<1x32xf32>
    %c0_3 = arith.constant 0 : index
    %c0_4 = arith.constant 0 : index
    %c0_5 = arith.constant 0 : index
    %2 = vector.load %arg1[%c0_3, %c0_4, %c0_5] : memref<8x32x16xf32, #tpu.memory_space<vmem>>, vector<8x32x16xf32>
    %3 = vector.shape_cast %2 : vector<8x32x16xf32> to vector<256x16xf32>
    %cst = arith.constant dense<0.000000e+00> : vector<256x32xf32>
    %4 = tpu.matmul %3, %0, %cst {dimension_numbers = #tpu.dot_dimension_numbers<[1], [0], [0], [1], [0, 0, 1, 1], [], []>} : vector<256x16xf32>, vector<16x32xf32>, vector<256x32xf32> -> vector<256x32xf32>
    %5 = vector.broadcast %1 : vector<1x32xf32> to vector<256x32xf32>
    %6 = arith.addf %4, %5 : vector<256x32xf32>
    %cst_6 = arith.constant 0.000000e+00 : f32
    %7 = vector.broadcast %cst_6 : f32 to vector<256x32xf32>
    %8 = arith.maximumf %6, %7 : vector<256x32xf32>
    %9 = vector.shape_cast %8 : vector<256x32xf32> to vector<8x32x32xf32>
    %cst_7 = arith.constant dense<0xFF800000> : vector<8x32xf32>
    %10 = vector.multi_reduction <maximumf>, %9, %cst_7 [1] : vector<8x32x32xf32> to vector<8x32xf32>
    %11 = vector.shape_cast %10 : vector<8x32xf32> to vector<8x1x32xf32>
    %12 = vector.shape_cast %11 : vector<8x1x32xf32> to vector<8x1x32xf32>
    %13 = vector.broadcast %12 : vector<8x1x32xf32> to vector<8x32x32xf32>
    %14 = tpu.concatenate %9, %13 in 2 : vector<8x32x32xf32>, vector<8x32x32xf32> -> vector<8x32x64xf32>
    %c0_8 = arith.constant 0 : index
    %c0_9 = arith.constant 0 : index
    %c0_10 = arith.constant 0 : index
    %15 = vector.load %arg4[%c0_8, %c0_9, %c0_10] : memref<8x32x64xf32, #tpu.memory_space<vmem>>, vector<8x32x64xf32>
    tpu.vector_store %arg4[%c0_8, %c0_9, %c0_10], %14 {strides = array<i32>} : memref<8x32x64xf32, #tpu.memory_space<vmem>>, vector<8x32x64xf32>,
    return
  }
  func.func @transform_0(%arg0: i32) -> (i32, i32, i32) {
    %c0_i32 = arith.constant 0 : i32
    %c0_i32_0 = arith.constant 0 : i32
    %c0_i32_1 = arith.constant 0 : i32
    return %arg0, %c0_i32, %c0_i32_0 : i32, i32, i32
  }
  func.func @transform_1(%arg0: i32) -> (i32, i32) {
    %c0_i32 = arith.constant 0 : i32
    %c0_i32_0 = arith.constant 0 : i32
    %c0_i32_1 = arith.constant 0 : i32
    return %c0_i32, %c0_i32_0 : i32, i32
  }
  func.func @transform_2(%arg0: i32) -> (i32, i32) {
    %c0_i32 = arith.constant 0 : i32
    %c0_i32_0 = arith.constant 0 : i32
    %c0_i32_1 = arith.constant 0 : i32
    return %c0_i32, %c0_i32_0 : i32, i32
  }
  func.func @transform_3(%arg0: i32) -> (i32, i32, i32) {
    %c0_i32 = arith.constant 0 : i32
    %c0_i32_0 = arith.constant 0 : i32
    %c0_i32_1 = arith.constant 0 : i32
    return %arg0, %c0_i32, %c0_i32_0 : i32, i32, i32
  }
}

</mosaic_0001>

<bundles_post_ra>
// kernel: pfn_layer.1
= control target key start
LH: loop header
LB: loop body
LE: loop exit
PB: predicated region body
PF: predicated region fallthrough
CT: control target
= control target key end

     0   :  { %vm56_vm0 = vcmask 130048   ;;  %s1324_s0 = inlined_call_operand.vmem [shape: f32[8,32,16], index: 0, kind: input, shape index: {}]   ;;  %s1325_s1 = inlined_call_operand.vmem [shape: f32[16,32], index: 1, kind: input, shape index: {}]   ;;  %s1326_s2 = inlined_call_operand.vmem [shape: f32[1,32], index: 2, kind: input, shape index: {}]   ;;  %s1327_s3 = inlined_call_operand.hbm [shape: f32[8,32,64], index: 3, kind: output, shape index: {}]  }
   0x1   :  { %v15_v0 = vld [vmem:[%s1325_s1] sm:$0xff]  ;;  %v16_v1 = vld [vmem:[%s1325_s1 + $0x8] sm:$0xff]  ;;  %v20_v7 = vld [vmem:[%s1324_s0 + $0x10] sm:$0xff] }
   0x2   :  { %v18_v2 = vld [vmem:[%s1324_s0] sm:$0xff]  ;;  %v747_v3 = vpack.c.bf16 %v16_v1, %v15_v0  ;;  %v19_v5 = vld [vmem:[%s1324_s0 + $0x8] sm:$0xff]  ;;  %v36_v8 = vld [vmem:[%s1324_s0 + $0x90] sm:$0xff] }
   0x3   :  { %699 = vmatprep.mubr.msk.f32.mxu0 %vm56_vm0, %v18_v2  ;;  %v34_v4 = vld [vmem:[%s1324_s0 + $0x80] sm:$0xff]  ;;  %v35_v6 = vld [vmem:[%s1324_s0 + $0x88] sm:$0xff]  ;;  %v21_v9 = vld [vmem:[%s1324_s0 + $0x18] sm:$0xff] }
   0x4   :  { %723 = vmatprep.mubr.msk.f32.mxu1 %vm56_vm0, %v34_v4  ;;  %748 = vmatprep.subr.bf16.mxu0 %v747_v3  ;;  %v37_v10 = vld [vmem:[%s1324_s0 + $0x98] sm:$0xff]  ;;  %v22_v11 = vld [vmem:[%s1324_s0 + $0x20] sm:$0xff] }
   0x5   :  { %751 = vmatprep.subr.bf16.mxu1 %v747_v3  ;;  %750 = vmatpush3.bf16.msra.mxu0 %v747_v3  ;;  %v38_v12 = vld [vmem:[%s1324_s0 + $0xa0] sm:$0xff] }
   0x6   :  { %752 = vmatpush3.bf16.msra.mxu1 %v747_v3 }
   0x8   :  { %700 = vmatmul.mubr.msk.f32.vlgmr.msra.gmra.mrb[0].mxu0 %vm56_vm0, %v19_v5 }
   0x9   :  { %724 = vmatmul.mubr.msk.f32.vlgmr.msra.gmra.mrb[0].mxu1 %vm56_vm0, %v35_v6  ;;  %702 = vmatprep.mubr.msk.f32.mxu0 %vm56_vm0, %v20_v7 }
   0xa   :  { %726 = vmatprep.mubr.msk.f32.mxu1 %vm56_vm0, %v36_v8 }
   0xc   :  { %703 = vmatmul.mubr.msk.f32.gmra.mrb[2].mxu0 %vm56_vm0, %v21_v9 }
   0xd   :  { %727 = vmatmul.mubr.msk.f32.gmra.mrb[2].mxu1 %vm56_vm0, %v37_v10 }
   0xe   :  { %8 = vsyncpa [#allocation3], 0  ;;  %705 = vmatprep.mubr.msk.f32.mxu0 %vm56_vm0, %v22_v11  ;;  %729 = vmatprep.mubr.msk.f32.mxu1 %vm56_vm0, %v38_v12  ;;  %v23_v13 = vld [vmem:[%s1324_s0 + $0x28] sm:$0xff]  ;;  %v24_v15 = vld [vmem:[%s1324_s0 + $0x30] sm:$0xff]  ;;  %vm410_vm1 = vcmask 261120   ;;  %vm579_vm2 = vcmask 523264  }
   0xf   :  { %v39_v14 = vld [vmem:[%s1324_s0 + $0xa8] sm:$0xff]  ;;  %v40_v16 = vld [vmem:[%s1324_s0 + $0xb0] sm:$0xff]  ;;  %v25_v17 = vld [vmem:[%s1324_s0 + $0x38] sm:$0xff] }
  0x10   :  { %706 = vmatmul.mubr.msk.f32.gmra.mrb[4].mxu0 %vm56_vm0, %v23_v13  ;;  %v41_v18 = vld [vmem:[%s1324_s0 + $0xb8] sm:$0xff]  ;;  %v26_v19 = vld [vmem:[%s1324_s0 + $0x40] sm:$0xff]  ;;  %v27_v21 = vld [vmem:[%s1324_s0 + $0x48] sm:$0xff] }
  0x11   :  { %730 = vmatmul.mubr.msk.f32.gmra.mrb[4].mxu1 %vm56_vm0, %v39_v14  ;;  %708 = vmatprep.mubr.msk.f32.mxu0 %vm56_vm0, %v24_v15  ;;  %v42_v20 = vld [vmem:[%s1324_s0 + $0xc0] sm:$0xff]  ;;  %v43_v22 = vld [vmem:[%s1324_s0 + $0xc8] sm:$0xff]  ;;  %v28_v23 = vld [vmem:[%s1324_s0 + $0x50] sm:$0xff] }
  0x12   :  { %732 = vmatprep.mubr.msk.f32.mxu1 %vm56_vm0, %v40_v16  ;;  %v44_v24 = vld [vmem:[%s1324_s0 + $0xd0] sm:$0xff]  ;;  %v29_v25 = vld [vmem:[%s1324_s0 + $0x58] sm:$0xff]  ;;  %v30_v27 = vld [vmem:[%s1324_s0 + $0x60] sm:$0xff] }
  0x13   :  { %v45_v26 = vld [vmem:[%s1324_s0 + $0xd8] sm:$0xff]  ;;  %v46_v28 = vld [vmem:[%s1324_s0 + $0xe0] sm:$0xff]  ;;  %v31_v29 = vld [vmem:[%s1324_s0 + $0x68] sm:$0xff] }
  0x14   :  { %709 = vmatmul.mubr.msk.f32.gmra.mrb[6].mxu0 %vm56_vm0, %v25_v17  ;;  %v47_v30 = vld [vmem:[%s1324_s0 + $0xe8] sm:$0xff]  ;;  %v32_v31 = vld [vmem:[%s1324_s0 + $0x70] sm:$0xff]  ;;  %v33_v33 = vld [vmem:[%s1324_s0 + $0x78] sm:$0xff] }
  0x15   :  { %733 = vmatmul.mubr.msk.f32.gmra.mrb[6].mxu1 %vm56_vm0, %v41_v18  ;;  %711 = vmatprep.mubr.msk.f32.mxu0 %vm56_vm0, %v26_v19  ;;  %v48_v32 = vld [vmem:[%s1324_s0 + $0xf0] sm:$0xff]  ;;  %v49_v34 = vld [vmem:[%s1324_s0 + $0xf8] sm:$0xff]  ;;  %v942_v35 = vld [vmem:[%s1326_s2] ss:$0 sm:$0xff]  ;;  %s781_s0 = smov 32   ;;  %s782_s2 = smov [#allocation2]  }
  0x16   :  { %735 = vmatprep.mubr.msk.f32.mxu1 %vm56_vm0, %v42_v20  ;;  %s617_s25 = sshll.u32 %s782_s2, 4  ;;  %s618_s25 = int_to_ptr.vmem [resolvable:$true] %s617_s25 }
  0x17   :  { %s757_s26 = scalar_lea.vmem %s618_s25, 4096  ;;  %p762_p1 = scmp.lt.s32.totalorder %s618_s25, %s618_s25 }
  0x18   :  { %712 = vmatmul.mubr.msk.f32.gmra.mrb[8].mxu0 %vm56_vm0, %v27_v21  ;;  %p758_p0 = scmp.ne.s32.totalorder %s618_s25, %s757_s26  ;;  %p763_p2 = scmp.lt.s32.totalorder %s757_s26, %s757_s26 }
  0x19   :  { %736 = vmatmul.mubr.msk.f32.gmra.mrb[8].mxu1 %vm56_vm0, %v43_v22  ;;  %714 = vmatprep.mubr.msk.f32.mxu0 %vm56_vm0, %v28_v23 }
  0x1a   :  { %738 = vmatprep.mubr.msk.f32.mxu1 %vm56_vm0, %v44_v24  ;;  %p764_p3 = por %p763_p2, %p762_p1 }
  0x1c   :  { %715 = vmatmul.mubr.msk.f32.gmra.mrb[10].mxu0 %vm56_vm0, %v29_v25  ;;  %p765_p4 = pnand %p764_p3, %p758_p0 }
  0x1d   :  { %739 = vmatmul.mubr.msk.f32.gmra.mrb[10].mxu1 %vm56_vm0, %v45_v26  ;;  %717 = vmatprep.mubr.msk.f32.mxu0 %vm56_vm0, %v30_v27 }
  0x1e   :  { %741 = vmatprep.mubr.msk.f32.mxu1 %vm56_vm0, %v46_v28 }
  0x20   :  { %718 = vmatmul.mubr.msk.f32.gmra.mrb[12].mxu0 %vm56_vm0, %v31_v29 }
  0x21   :  { %742 = vmatmul.mubr.msk.f32.gmra.mrb[12].mxu1 %vm56_vm0, %v47_v30  ;;  %720 = vmatprep.mubr.msk.f32.mxu0 %vm56_vm0, %v32_v31 }
  0x22   :  { %744 = vmatprep.mubr.msk.f32.mxu1 %vm56_vm0, %v48_v32 }
  0x24   :  { %721 = vmatmul.mubr.msk.f32.gmra.mrb[14].mxu0 %vm56_vm0, %v33_v33 }
  0x25   :  { %745 = vmatmul.mubr.msk.f32.gmra.mrb[14].mxu1 %vm56_vm0, %v49_v34 }
  0xdb   :  { %v701_v36 = vpop.f32.mrb[0].mxu0 }
  0xdc   :  { %v725_v37 = vpop.f32.mrb[0].mxu1  ;;  %v945_v38 = vadd.f32 %v701_v36, %v942_v35  ;;  %v219_v39 = vpop.f32.mrb[1].mxu0 }
  0xdd   :  { %v948_v40 = vadd.f32 %v725_v37, %v942_v35  ;;  %v299_v41 = vpop.f32.mrb[1].mxu1  ;;  %v951_v42 = vadd.f32 %v942_v35, %v219_v39 }
  0xde   :  { %v954_v43 = vadd.f32 %v942_v35, %v299_v41  ;;  %v1358_v44 = vmax.f32 %v945_v38, 0.0 }
  0xdf   :  { %v1348_v45 = vmax.f32 %v948_v40, 0.0  ;;  %v1359_v46 = vmax.f32 %v951_v42, 0.0  ;;  %v704_v48 = vpop.f32.mrb[2].mxu0 }
  0xe0   :  { %v1353_v47 = vmax.f32 %v954_v43, 0.0  ;;  %v728_v49 = vpop.f32.mrb[2].mxu1  ;;  %v412_v50 = vsel %vm410_vm1, %v1358_v44, -inf  ;;  %v967_v52 = vadd.f32 %v704_v48, %v942_v35  ;;  %v229_v54 = vpop.f32.mrb[3].mxu0 }
  0xe1   :  { %v464_v51 = vsel %vm410_vm1, %v1348_v45, -inf  ;;  %v970_v53 = vadd.f32 %v728_v49, %v942_v35  ;;  %v309_v55 = vpop.f32.mrb[3].mxu1  ;;  %v411_v56 = vsel %vm410_vm1, %v1359_v46, -inf  ;;  %v979_v58 = vadd.f32 %v942_v35, %v229_v54 }
  0xe2   :  { %v463_v57 = vsel %vm410_vm1, %v1353_v47, -inf  ;;  %v982_v59 = vadd.f32 %v942_v35, %v309_v55  ;;  %v1354_v62 = vmax.f32 %v967_v52, 0.0  ;;  %v413_v3 = vmax.f32 %v411_v56, %v412_v50 }
  0xe3   :  { %v465_v60 = vmax.f32 %v463_v57, %v464_v51  ;;  %v1345_v61 = vmax.f32 %v970_v53, 0.0  ;;  %v1357_v63 = vmax.f32 %v979_v58, 0.0  ;;  %v707_v1 = vpop.f32.mrb[4].mxu0 }
  0xe4   :  { %v1347_v0 = vmax.f32 %v982_v59, 0.0  ;;  %v731_v2 = vpop.f32.mrb[4].mxu1  ;;  %v992_v5 = vadd.f32 %v707_v1, %v942_v35  ;;  %v239_v6 = vpop.f32.mrb[5].mxu0  ;;  %v416_v17 = vsel %vm410_vm1, %v1354_v62, -inf }
  0xe5   :  { %v468_v4 = vsel %vm410_vm1, %v1345_v61, -inf  ;;  %v995_v7 = vadd.f32 %v731_v2, %v942_v35  ;;  %v319_v8 = vpop.f32.mrb[5].mxu1  ;;  %v414_v9 = vsel %vm410_vm1, %v1357_v63, -inf  ;;  %v1004_v11 = vadd.f32 %v942_v35, %v239_v6 }
  0xe6   :  { %v466_v10 = vsel %vm410_vm1, %v1347_v0, -inf  ;;  %v1007_v12 = vadd.f32 %v942_v35, %v319_v8  ;;  %v415_v13 = vmax.f32 %v413_v3, %v414_v9  ;;  %v1341_v15 = vmax.f32 %v992_v5, 0.0 }
  0xe7   :  { %v467_v14 = vmax.f32 %v465_v60, %v466_v10  ;;  %v1337_v16 = vmax.f32 %v995_v7, 0.0  ;;  %v1344_v18 = vmax.f32 %v1004_v11, 0.0  ;;  %v710_v20 = vpop.f32.mrb[6].mxu0 }
  0xe8   :  { %v1338_v19 = vmax.f32 %v1007_v12, 0.0  ;;  %v734_v21 = vpop.f32.mrb[6].mxu1  ;;  %v417_v22 = vmax.f32 %v415_v13, %v416_v17  ;;  %v425_v24 = vsel %vm410_vm1, %v1341_v15, -inf  ;;  %v249_v26 = vpop.f32.mrb[7].mxu0  ;;  %v1029_v30 = vadd.f32 %v710_v20, %v942_v35 }
  0xe9   :  { %v469_v23 = vmax.f32 %v467_v14, %v468_v4  ;;  %v477_v25 = vsel %vm410_vm1, %v1337_v16, -inf  ;;  %v329_v27 = vpop.f32.mrb[7].mxu1  ;;  %v424_v28 = vsel %vm410_vm1, %v1344_v18, -inf  ;;  %v1032_v31 = vadd.f32 %v734_v21, %v942_v35 }
  0xea   :  { %v476_v29 = vsel %vm410_vm1, %v1338_v19, -inf  ;;  %v426_v33 = vmax.f32 %v424_v28, %v425_v24  ;;  %v1035_v36 = vadd.f32 %v942_v35, %v249_v26  ;;  %v1339_v37 = vmax.f32 %v1029_v30, 0.0 }
  0xeb   :  { %v470_v32 = vrot.slane %v469_v23, 4  ;;  %v478_v34 = vmax.f32 %v476_v29, %v477_v25  ;;  %v1334_v39 = vmax.f32 %v1032_v31, 0.0  ;;  %v1040_v41 = vadd.f32 %v942_v35, %v329_v27  ;;  %v713_v48 = vpop.f32.mrb[8].mxu0 }
  0xec   :  { %v737_v49 = vpop.f32.mrb[8].mxu1  ;;  %v418_v50 = vrot.slane %v417_v22, 4  ;;  %v1340_v51 = vmax.f32 %v1035_v36, 0.0  ;;  %v1044_v54 = vadd.f32 %v713_v48, %v942_v35  ;;  %v259_v55 = vpop.f32.mrb[9].mxu0  ;;  %v429_v1 = vsel %vm410_vm1, %v1339_v37, -inf }
  0xed   :  { %v1047_v56 = vadd.f32 %v737_v49, %v942_v35  ;;  %v339_v57 = vpop.f32.mrb[9].mxu1  ;;  %v1049_v60 = vmax.f32 %v469_v23, %v470_v32  ;;  %v481_v2 = vsel %vm410_vm1, %v1334_v39, -inf  ;;  %v1335_v3 = vmax.f32 %v1040_v41, 0.0 }
  0xee   :  { %v1059_v4 = vadd.f32 %v942_v35, %v259_v55  ;;  %v427_v6 = vsel %vm410_vm1, %v1340_v51, -inf  ;;  %v1328_v8 = vmax.f32 %v1044_v54, 0.0  ;;  %v1067_v10 = vadd.f32 %v942_v35, %v339_v57 }
  0xef   :  { %v1331_v9 = vmax.f32 %v1047_v56, 0.0  ;;  %v428_v13 = vmax.f32 %v426_v33, %v427_v6  ;;  %v479_v14 = vsel %vm410_vm1, %v1335_v3, -inf  ;;  %v716_v20 = vpop.f32.mrb[10].mxu0  ;;  %v419_v23 = vmax.f32 %v417_v22, %v418_v50 }
  0xf0   :  { %v1329_v17 = vmax.f32 %v1059_v4, 0.0  ;;  %v740_v21 = vpop.f32.mrb[10].mxu1  ;;  %v480_v24 = vmax.f32 %v478_v34, %v479_v14  ;;  %v438_v25 = vsel %vm410_vm1, %v1328_v8, -inf  ;;  %v1332_v27 = vmax.f32 %v1067_v10, 0.0  ;;  %v269_v28 = vpop.f32.mrb[11].mxu0 }
  0xf1   :  { %v490_v26 = vsel %vm410_vm1, %v1331_v9, -inf  ;;  %v349_v29 = vpop.f32.mrb[11].mxu1  ;;  %v1080_v32 = vmax.f32 %v428_v13, %v429_v1  ;;  %v1086_v22 = vadd.f32 %v716_v20, %v942_v35  ;;  %v1089_v34 = vadd.f32 %v740_v21, %v942_v35 }
  0xf2   :  { %v437_v33 = vsel %vm410_vm1, %v1329_v17, -inf  ;;  %v482_v48 = vmax.f32 %v480_v24, %v481_v2  ;;  %v489_v50 = vsel %vm410_vm1, %v1332_v27, -inf  ;;  %v1095_v55 = vadd.f32 %v942_v35, %v269_v28 }
  0xf3   :  { %v439_v49 = vmax.f32 %v437_v33, %v438_v25  ;;  %v431_v57 = vrot.slane %v1080_v32, 4  ;;  %v491_v1 = vmax.f32 %v489_v50, %v490_v26  ;;  %v1330_v6 = vmax.f32 %v1086_v22, 0.0  ;;  %v719_v14 = vpop.f32.mrb[12].mxu0 }
  0xf4   :  { %v1333_v13 = vmax.f32 %v1089_v34, 0.0  ;;  %v743_v20 = vpop.f32.mrb[12].mxu1  ;;  %v1336_v21 = vmax.f32 %v1095_v55, 0.0  ;;  %v1102_v2 = vadd.f32 %v942_v35, %v349_v29  ;;  %v1105_v24 = vadd.f32 %v719_v14, %v942_v35  ;;  %v279_v25 = vpop.f32.mrb[13].mxu0 }
  0xf5   :  { %v1108_v28 = vadd.f32 %v743_v20, %v942_v35  ;;  %v359_v33 = vpop.f32.mrb[13].mxu1  ;;  %v442_v26 = vsel %vm410_vm1, %v1330_v6, -inf  ;;  %v1117_v8 = vadd.f32 %v942_v35, %v279_v25  ;;  %v420_v25 = vrot.slane %v419_v23, 2 }
  0xf6   :  { %v494_v50 = vsel %vm410_vm1, %v1333_v13, -inf  ;;  %v1120_v29 = vadd.f32 %v942_v35, %v359_v33  ;;  %v440_v14 = vsel %vm410_vm1, %v1336_v21, -inf  ;;  %v1342_v20 = vmax.f32 %v1102_v2, 0.0 }
  0xf7   :  { %v1343_v17 = vmax.f32 %v1105_v24, 0.0  ;;  %v1346_v6 = vmax.f32 %v1108_v28, 0.0  ;;  %v441_v9 = vmax.f32 %v439_v49, %v440_v14  ;;  %v1352_v27 = vmax.f32 %v1117_v8, 0.0  ;;  %v722_v39 = vpop.f32.mrb[14].mxu0 }
  0xf8   :  { %v1349_v13 = vmax.f32 %v1120_v29, 0.0  ;;  %v746_v3 = vpop.f32.mrb[14].mxu1  ;;  %v492_v33 = vsel %vm410_vm1, %v1342_v20, -inf  ;;  %v1140_v49 = vadd.f32 %v722_v39, %v942_v35  ;;  %v289_v14 = vpop.f32.mrb[15].mxu0  ;;  %v421_v61 = vmax.f32 %v419_v23, %v420_v25 }
  0xf9   :  { %v451_v21 = vsel %vm410_vm1, %v1343_v17, -inf  ;;  %v503_v16 = vsel %vm410_vm1, %v1346_v6, -inf  ;;  %v369_v19 = vpop.f32.mrb[15].mxu1  ;;  %v443_v37 = vmax.f32 %v441_v9, %v442_v26  ;;  %v493_v51 = vmax.f32 %v491_v1, %v492_v33 }
  0xfa   :  { %v450_v15 = vsel %vm410_vm1, %v1352_v27, -inf  ;;  %v502_v20 = vsel %vm410_vm1, %v1349_v13, -inf  ;;  %v1350_v6 = vmax.f32 %v1140_v49, 0.0  ;;  %v1150_v45 = vadd.f32 %v746_v3, %v942_v35 }
  0xfb   :  { %v452_v17 = vmax.f32 %v450_v15, %v451_v21  ;;  %v504_v18 = vmax.f32 %v502_v20, %v503_v16  ;;  %v444_v0 = vrot.slane %v443_v37, 4  ;;  %v495_v39 = vmax.f32 %v493_v51, %v494_v50 }
  0xfc   :  { %v1153_v9 = vadd.f32 %v942_v35, %v289_v14  ;;  %v422_v1 = vrot.slane %v421_v61, 1  ;;  %v455_v26 = vsel %vm410_vm1, %v1350_v6, -inf  ;;  %v1159_v33 = vadd.f32 %v942_v35, %v369_v19 }
  0xfd   :  { %v472_v15 = vrot.slane %v1049_v60, 2  ;;  %v496_v16 = vrot.slane %v495_v39, 4  ;;  %v1351_v23 = vmax.f32 %v1150_v45, 0.0  ;;  %v483_v3 = vrot.slane %v482_v48, 4 }
  0xfe   :  { %v1355_v51 = vmax.f32 %v1153_v9, 0.0  ;;  %v423_v21 = vmax.f32 %v421_v61, %v422_v1  ;;  %v1356_v50 = vmax.f32 %v1159_v33, 0.0  ;;  %v432_v25 = vmax.f32 %v1080_v32, %v431_v57 }
  0xff   :  { %v473_v20 = vmax.f32 %v1049_v60, %v472_v15  ;;  %v507_v35 = vsel %vm410_vm1, %v1351_v23, -inf  ;;  %v484_v14 = vmax.f32 %v482_v48, %v483_v3  ;;  %v445_v13 = vmax.f32 %v443_v37, %v444_v0 }
 0x100   :  { %v453_v19 = vsel %vm410_vm1, %v1355_v51, -inf  ;;  %523 = vrot.lane.b32.xlu0 %v423_v21, %s781_s0  ;;  %v505_v60 = vsel %vm410_vm1, %v1356_v50, -inf  ;;  %v433_v32 = vrot.slane %v432_v25, 2  ;;  %v497_v23 = vmax.f32 %v495_v39, %v496_v16 }
 0x101   :  { %v454_v61 = vmax.f32 %v452_v17, %v453_v19  ;;  %v474_v1 = vrot.slane %v473_v20, 1  ;;  %v506_v57 = vmax.f32 %v504_v18, %v505_v60  ;;  %v485_v15 = vrot.slane %v484_v14, 2 }
 0x102   :  { %v446_v6 = vrot.slane %v445_v13, 2  ;;  %v434_v62 = vmax.f32 %v432_v25, %v433_v32  ;;  %v498_v37 = vrot.slane %v497_v23, 2 }
 0x103   :  { %v456_v27 = vmax.f32 %v454_v61, %v455_v26  ;;  %v475_v47 = vmax.f32 %v473_v20, %v474_v1  ;;  %v508_v51 = vmax.f32 %v506_v57, %v507_v35  ;;  %v486_v48 = vmax.f32 %v484_v14, %v485_v15 }
 0x104   :  { %v447_v0 = vmax.f32 %v445_v13, %v446_v6  ;;  %v435_v17 = vrot.slane %v434_v62, 1  ;;  %v499_v63 = vmax.f32 %v497_v23, %v498_v37  ;;  %v1362_v35 = vmax.f32 %v979_v58, 0.0 }
 0x105   :  { %v457_v3 = vrot.slane %v456_v27, 4  ;;  %531 = vrot.lane.b32.xlu0 %v475_v47, %s781_s0  ;;  %v509_v21 = vrot.slane %v508_v51, 4  ;;  %v487_v19 = vrot.slane %v486_v48, 1  ;;  %v1363_v61 = vmax.f32 %v967_v52, 0.0 }
 0x106   :  { %v448_v50 = vrot.slane %v447_v0, 1  ;;  %v436_v44 = vmax.f32 %v434_v62, %v435_v17  ;;  %v500_v46 = vrot.slane %v499_v63, 1  ;;  %v1365_v58 = vmax.f32 %v948_v40, 0.0 }
 0x107   :  { %v458_v18 = vmax.f32 %v456_v27, %v457_v3  ;;  %v488_v60 = vmax.f32 %v486_v48, %v487_v19  ;;  %v510_v39 = vmax.f32 %v508_v51, %v509_v21  ;;  %v1360_v51 = vmax.f32 %v951_v42, 0.0 }
 0x108   :  { %v449_v6 = vmax.f32 %v447_v0, %v448_v50  ;;  %v501_v13 = vmax.f32 %v499_v63, %v500_v46  ;;  %v1361_v63 = vmax.f32 %v945_v38, 0.0  ;;  %v1364_v38 = vmax.f32 %v954_v43, 0.0 }
 0x109   :  { %525 = vrot.lane.b32.xlu0 %v436_v44, %s781_s0  ;;  %v459_v26 = vrot.slane %v458_v18, 2  ;;  %533 = vrot.lane.b32.xlu1 %v488_v60, %s781_s0  ;;  %v511_v16 = vrot.slane %v510_v39, 2  ;;  %v1366_v52 = vmax.f32 %v982_v59, 0.0  ;;  %v1367_v48 = vmax.f32 %v970_v53, 0.0 }
 0x10a   :  { %v1368_v37 = vmax.f32 %v1004_v11, 0.0  ;;  %v1369_v3 = vmax.f32 %v992_v5, 0.0  ;;  %v1370_v17 = vmax.f32 %v1035_v36, 0.0  ;;  %v1371_v19 = vmax.f32 %v1029_v30, 0.0 }
 0x10b   :  { %v460_v20 = vmax.f32 %v458_v18, %v459_v26  ;;  %v512_v47 = vmax.f32 %v510_v39, %v511_v16  ;;  %v1372_v60 = vmax.f32 %v1007_v12, 0.0  ;;  %v1373_v11 = vmax.f32 %v995_v7, 0.0 }
 0x10c   :  { %v1374_v5 = vmax.f32 %v1040_v41, 0.0  ;;  %v1375_v36 = vmax.f32 %v1032_v31, 0.0  ;;  %v1376_v30 = vmax.f32 %v1067_v10, 0.0  ;;  %v1377_v41 = vmax.f32 %v1047_v56, 0.0 }
 0x10d   :  { %535 = vrot.lane.b32.xlu0 %v501_v13, %s781_s0  ;;  %v461_v25 = vrot.slane %v460_v20, 1  ;;  %527 = vrot.lane.b32.xlu1 %v449_v6, %s781_s0  ;;  %v513_v27 = vrot.slane %v512_v47, 1  ;;  %v1381_v10 = vmax.f32 %v1044_v54, 0.0  ;;  %v1382_v56 = vmax.f32 %v1095_v55, 0.0 }
 0x10f   :  { %v462_v62 = vmax.f32 %v460_v20, %v461_v25  ;;  %v514_v23 = vmax.f32 %v512_v47, %v513_v27  ;;  %v1378_v20 = vmax.f32 %v1102_v2, 0.0  ;;  %v1379_v25 = vmax.f32 %v1089_v34, 0.0 }
 0x110   :  { %v1380_v27 = vmax.f32 %v1059_v4, 0.0  ;;  %v1383_v2 = vmax.f32 %v1086_v22, 0.0  ;;  %v1384_v4 = vmax.f32 %v1117_v8, 0.0  ;;  %v1385_v34 = vmax.f32 %v1105_v24, 0.0 }
 0x111   :  { %529 = vrot.lane.b32.xlu1 %v462_v62, %s781_s0  ;;  %v1388_v24 = vmax.f32 %v1120_v29, 0.0 }
 0x115   :  { %537 = vrot.lane.b32.xlu1 %v514_v23, %s781_s0 }
 0x172   :  { %v524_v44 = vpop.permute.xlu0 %523 }
 0x173   :  { %v547_v46 = vsel %vm410_vm1, %v1360_v51, %v524_v44  ;;  %v548_v50 = vsel %vm410_vm1, %v1361_v63, %v524_v44  ;;  %v549_v14 = vsel %vm410_vm1, %v1362_v35, %v524_v44  ;;  %v550_v1 = vsel %vm410_vm1, %v1363_v61, %v524_v44 }
 0x174   :  { %580 = vst.msk [vmem:[#allocation2] sm:$0xff] %vm579_vm2, %v547_v46  ;;  %581 = vst.msk [vmem:[#allocation2 + $0x8] sm:$0xff] %vm579_vm2, %v548_v50  ;;  %v1386_v63 = vmax.f32 %v1153_v9, 0.0  ;;  %v1387_v35 = vmax.f32 %v1140_v49, 0.0  ;;  %v1389_v49 = vmax.f32 %v1108_v28, 0.0 }
 0x175   :  { %582 = vst.msk [vmem:[#allocation2 + $0x10] sm:$0xff] %vm579_vm2, %v549_v14  ;;  %583 = vst.msk [vmem:[#allocation2 + $0x18] sm:$0xff] %vm579_vm2, %v550_v1  ;;  %v1390_v1 = vmax.f32 %v1159_v33, 0.0 }
 0x177   :  { %v532_v42 = vpop.permute.xlu0 %531 }
 0x178   :  { %v563_v32 = vsel %vm410_vm1, %v1364_v38, %v532_v42  ;;  %v564_v57 = vsel %vm410_vm1, %v1365_v58, %v532_v42  ;;  %v565_v15 = vsel %vm410_vm1, %v1366_v52, %v532_v42  ;;  %v566_v0 = vsel %vm410_vm1, %v1367_v48, %v532_v42 }
 0x179   :  { %596 = vst.msk [vmem:[#allocation2 + $0x80] sm:$0xff] %vm579_vm2, %v563_v32  ;;  %597 = vst.msk [vmem:[#allocation2 + $0x88] sm:$0xff] %vm579_vm2, %v564_v57  ;;  %v1391_v38 = vmax.f32 %v1150_v45, 0.0 }
 0x17a   :  { %598 = vst.msk [vmem:[#allocation2 + $0x90] sm:$0xff] %vm579_vm2, %v565_v15  ;;  %599 = vst.msk [vmem:[#allocation2 + $0x98] sm:$0xff] %vm579_vm2, %v566_v0 }
 0x17b   :  { %v526_v43 = vpop.permute.xlu0 %525  ;;  %v534_v40 = vpop.permute.xlu1 %533 }
 0x17c   :  { %v551_v59 = vsel %vm410_vm1, %v1368_v37, %v526_v43  ;;  %v552_v53 = vsel %vm410_vm1, %v1369_v3, %v526_v43  ;;  %v553_v21 = vsel %vm410_vm1, %v1370_v17, %v526_v43  ;;  %v554_v18 = vsel %vm410_vm1, %v1371_v19, %v526_v43 }
 0x17d   :  { %v567_v39 = vsel %vm410_vm1, %v1372_v60, %v534_v40  ;;  %v568_v26 = vsel %vm410_vm1, %v1373_v11, %v534_v40  ;;  %v569_v6 = vsel %vm410_vm1, %v1374_v5, %v534_v40  ;;  %v570_v13 = vsel %vm410_vm1, %v1375_v36, %v534_v40  ;;  %584 = vst.msk [vmem:[#allocation2 + $0x20] sm:$0xff] %vm579_vm2, %v551_v59 }
 0x17e   :  { %585 = vst.msk [vmem:[#allocation2 + $0x28] sm:$0xff] %vm579_vm2, %v552_v53  ;;  %586 = vst.msk [vmem:[#allocation2 + $0x30] sm:$0xff] %vm579_vm2, %v553_v21 }
 0x17f   :  { %587 = vst.msk [vmem:[#allocation2 + $0x38] sm:$0xff] %vm579_vm2, %v554_v18  ;;  %600 = vst.msk [vmem:[#allocation2 + $0xa0] sm:$0xff] %vm579_vm2, %v567_v39  ;;  %v536_v7 = vpop.permute.xlu0 %535  ;;  %v528_v12 = vpop.permute.xlu1 %527 }
 0x180   :  { %601 = vst.msk [vmem:[#allocation2 + $0xa8] sm:$0xff] %vm579_vm2, %v568_v26  ;;  %602 = vst.msk [vmem:[#allocation2 + $0xb0] sm:$0xff] %vm579_vm2, %v569_v6  ;;  %v571_v31 = vsel %vm410_vm1, %v1376_v30, %v536_v7  ;;  %v572_v16 = vsel %vm410_vm1, %v1377_v41, %v536_v7  ;;  %v573_v47 = vsel %vm410_vm1, %v1378_v20, %v536_v7 }
 0x181   :  { %603 = vst.msk [vmem:[#allocation2 + $0xb8] sm:$0xff] %vm579_vm2, %v570_v13  ;;  %v574_v62 = vsel %vm410_vm1, %v1379_v25, %v536_v7  ;;  %v555_v23 = vsel %vm410_vm1, %v1380_v27, %v528_v12  ;;  %v556_v44 = vsel %vm410_vm1, %v1381_v10, %v528_v12  ;;  %v557_v51 = vsel %vm410_vm1, %v1382_v56, %v528_v12 }
 0x182   :  { %v558_v46 = vsel %vm410_vm1, %v1383_v2, %v528_v12  ;;  %604 = vst.msk [vmem:[#allocation2 + $0xc0] sm:$0xff] %vm579_vm2, %v571_v31  ;;  %605 = vst.msk [vmem:[#allocation2 + $0xc8] sm:$0xff] %vm579_vm2, %v572_v16 }
 0x183   :  { %606 = vst.msk [vmem:[#allocation2 + $0xd0] sm:$0xff] %vm579_vm2, %v573_v47  ;;  %607 = vst.msk [vmem:[#allocation2 + $0xd8] sm:$0xff] %vm579_vm2, %v574_v62  ;;  %v530_v54 = vpop.permute.xlu1 %529 }
 0x184   :  { %588 = vst.msk [vmem:[#allocation2 + $0x40] sm:$0xff] %vm579_vm2, %v555_v23  ;;  %589 = vst.msk [vmem:[#allocation2 + $0x48] sm:$0xff] %vm579_vm2, %v556_v44  ;;  %v559_v22 = vsel %vm410_vm1, %v1384_v4, %v530_v54  ;;  %v560_v55 = vsel %vm410_vm1, %v1385_v34, %v530_v54  ;;  %v561_v50 = vsel %vm410_vm1, %v1386_v63, %v530_v54 }
 0x185   :  { %590 = vst.msk [vmem:[#allocation2 + $0x50] sm:$0xff] %vm579_vm2, %v557_v51  ;;  %591 = vst.msk [vmem:[#allocation2 + $0x58] sm:$0xff] %vm579_vm2, %v558_v46  ;;  %v562_v14 = vsel %vm410_vm1, %v1387_v35, %v530_v54 }
 0x186   :  { %592 = vst.msk [vmem:[#allocation2 + $0x60] sm:$0xff] %vm579_vm2, %v559_v22  ;;  %593 = vst.msk [vmem:[#allocation2 + $0x68] sm:$0xff] %vm579_vm2, %v560_v55 }
 0x187   :  { %594 = vst.msk [vmem:[#allocation2 + $0x70] sm:$0xff] %vm579_vm2, %v561_v50  ;;  %595 = vst.msk [vmem:[#allocation2 + $0x78] sm:$0xff] %vm579_vm2, %v562_v14  ;;  %v538_v8 = vpop.permute.xlu1 %537 }
 0x188   :  { %v575_v9 = vsel %vm410_vm1, %v1388_v24, %v538_v8  ;;  %v576_v61 = vsel %vm410_vm1, %v1389_v49, %v538_v8  ;;  %v577_v42 = vsel %vm410_vm1, %v1390_v1, %v538_v8  ;;  %v578_v32 = vsel %vm410_vm1, %v1391_v38, %v538_v8 }
 0x189   :  { %608 = vst.msk [vmem:[#allocation2 + $0xe0] sm:$0xff] %vm579_vm2, %v575_v9  ;;  %609 = vst.msk [vmem:[#allocation2 + $0xe8] sm:$0xff] %vm579_vm2, %v576_v61 }
 0x18a   :  { %610 = vst.msk [vmem:[#allocation2 + $0xf0] sm:$0xff] %vm579_vm2, %v577_v42  ;;  %611 = vst.msk [vmem:[#allocation2 + $0xf8] sm:$0xff] %vm579_vm2, %v578_v32 }
 0x18b   :  { %768 = shalt.err (!%p765_p4)
}
 0x18c   :  { %s769_s29 = scalar_lea.hbm %s1327_s3, 4096 }
 0x18d   :  { %p770_p5 = scmp.ne.s32.totalorder %s1327_s3, %s769_s29  ;;  %p773_p6 = scmp.lt.u32.totalorder %s769_s29, %s1327_s3 }
 0x18f   :  { %p775_p7 = pnand %p773_p6, %p770_p5 }
 0x191   :  { %778 = shalt.err (!%p775_p7)
}
 0x192   :  { %s783_s7 = smov 128   ;;  %s784_s8 = smov 8  }
 0x193   :  { %623 = dma.vmem_to_hbm [thread:$0]  %s618_s25, 4096, %s1327_s3, [#allocation3], %s783_s7, %s783_s7, %s784_s8  }
 0x194   :  { %779 = dma.done.wait [#allocation3], 4096  }
 0x195   :  { %780 = vsyncadd [#allocation3], 4294963200 }
 0x196   :  { %627 = vsyncpa [#allocation3], 1 }

</bundles_post_ra>
